<compile_context>
chip_gen: v7x
topology: tpu7x:2x2x1
jax: 0.10.0
libtpu: 0.0.40
codegen_flags: <defaults>
</compile_context>

<pallas_src>
import functools

import jax
import jax.numpy as jnp
from jax.experimental import pallas as pl
from jax.experimental.pallas import tpu as pltpu

BOTT_MID = 16  # BottConv mid_channels (fixed to 16 in PAF.__init__)


# ---------------------------------------------------------------------------
# Tiling helpers (pixels on lanes, tiles are multiples of 128)
# ---------------------------------------------------------------------------
def _choose_tile(num_pixels, target=1024):
    """Pick a lane tile tp (multiple of 128, <= target) and padded pixel count.

    Padding never exceeds 127 pixels (we pad to the next multiple of 128 and
    pick tp dividing that).  When possible we keep >= 2 blocks so the
    'parallel' grid axis can shard across both TensorCores on v7x.
    """
    p128 = -(-num_pixels // 128) * 128          # round up to a multiple of 128
    tp = 128
    for cand in range(target, 127, -128):       # largest divisor of p128 <= target
        if p128 % cand == 0:
            tp = cand
            break
    if tp == p128 and p128 >= 256 and (p128 // 2) % 128 == 0:
        tp = p128 // 2                          # prefer >= 2 blocks (megacore)
    return tp, p128


def _pad_pixels(x, p_pad):
    """x: (N, C, P) -> (N, C, p_pad), zero padded on the pixel axis."""
    p = x.shape[-1]
    if p_pad == p:
        return x
    return jnp.pad(x, ((0, 0), (0, 0), (0, p_pad - p)))


# ---------------------------------------------------------------------------
# Pallas kernels (channels-first blocks: (C, tp))
# ---------------------------------------------------------------------------
def ft_kernel(x_ref, w1_ref, b1_ref, w2_ref, sh_ref, o_ref):
    """feature_transform: (folded) pw1 + bias -> (folded) pw2 -> + BN shift."""
    x = x_ref[...].astype(jnp.float32)                               # (cin, tp)
    h = jnp.dot(w1_ref[...], x, preferred_element_type=jnp.float32)  # (mid, tp)
    h = h + b1_ref[...]
    y = jnp.dot(w2_ref[...], h, preferred_element_type=jnp.float32)  # (cmid, tp)
    o_ref[...] = (y + sh_ref[...]).astype(o_ref.dtype)


def paf_fuse_kernel(base_ref, gq_ref, rg_ref,
                    fw1_ref, fb1_ref, fw2_ref, fsh_ref,
                    cw1_ref, cb1_ref, cw2_ref, csh_ref,
                    o_ref):
    """base_key = FT(base); sim = sigmoid(CA(base_key * gq)); blend."""
    base = base_ref[...].astype(jnp.float32)                         # (cin, tp)

    # feature_transform(base_feat)   (depthwise & BN scale pre-folded)
    h = jnp.dot(fw1_ref[...], base, preferred_element_type=jnp.float32) + fb1_ref[...]
    base_key = jnp.dot(fw2_ref[...], h, preferred_element_type=jnp.float32) + fsh_ref[...]

    # channel_adapter(base_key * guidance_query)
    prod = base_key * gq_ref[...].astype(jnp.float32)                # (cmid, tp)
    g = jnp.dot(cw1_ref[...], prod, preferred_element_type=jnp.float32) + cb1_ref[...]
    s = jnp.dot(cw2_ref[...], g, preferred_element_type=jnp.float32) + csh_ref[...]
    sim = jax.nn.sigmoid(s)                                          # (cin, tp)

    rg = rg_ref[...].astype(jnp.float32)
    o_ref[...] = ((1.0 - sim) * base + sim * rg).astype(o_ref.dtype)


# ---------------------------------------------------------------------------
# Wrappers around pallas_call
# ---------------------------------------------------------------------------
def feature_transform_pallas(x_ncp, ft_p, tp):
    """x_ncp: (N, cin, P_pad) -> (N, cmid, P_pad)."""
    n, cin, p_pad = x_ncp.shape
    mid = ft_p["w1"].shape[0]
    cmid = ft_p["w2"].shape[0]
    grid = (n, p_pad // tp)

    full = lambda shape: pl.BlockSpec(shape, lambda b, i: (0, 0))
    return pl.pallas_call(
        ft_kernel,
        out_shape=jax.ShapeDtypeStruct((n, cmid, p_pad), x_ncp.dtype),
        grid=grid,
        in_specs=[
            pl.BlockSpec((None, cin, tp), lambda b, i: (b, 0, i)),
            full((mid, cin)), full((mid, 1)),
            full((cmid, mid)), full((cmid, 1)),
        ],
        out_specs=pl.BlockSpec((None, cmid, tp), lambda b, i: (b, 0, i)),
        compiler_params=pltpu.CompilerParams(
            dimension_semantics=("parallel", "parallel")),
    )(x_ncp, ft_p["w1"], ft_p["b1"], ft_p["w2"], ft_p["shift"])


def paf_fuse_pallas(base_ncp, gq_ncp, rg_ncp, ft_p, ca_p, tp):
    """base/rg: (N, cin, P_pad); gq: (N, cmid, P_pad) -> (N, cin, P_pad)."""
    n, cin, p_pad = base_ncp.shape
    cmid = gq_ncp.shape[1]
    mid = ft_p["w1"].shape[0]
    grid = (n, p_pad // tp)

    full = lambda shape: pl.BlockSpec(shape, lambda b, i: (0, 0))
    return pl.pallas_call(
        paf_fuse_kernel,
        out_shape=jax.ShapeDtypeStruct((n, cin, p_pad), base_ncp.dtype),
        grid=grid,
        in_specs=[
            pl.BlockSpec((None, cin, tp), lambda b, i: (b, 0, i)),
            pl.BlockSpec((None, cmid, tp), lambda b, i: (b, 0, i)),
            pl.BlockSpec((None, cin, tp), lambda b, i: (b, 0, i)),
            # feature_transform params (folded)
            full((mid, cin)), full((mid, 1)), full((cmid, mid)), full((cmid, 1)),
            # channel_adapter params (folded)
            full((mid, cmid)), full((mid, 1)), full((cin, mid)), full((cin, 1)),
        ],
        out_specs=pl.BlockSpec((None, cin, tp), lambda b, i: (b, 0, i)),
        compiler_params=pltpu.CompilerParams(
            dimension_semantics=("parallel", "parallel")),
    )(base_ncp, gq_ncp, rg_ncp,
      ft_p["w1"], ft_p["b1"], ft_p["w2"], ft_p["shift"],
      ca_p["w1"], ca_p["b1"], ca_p["w2"], ca_p["shift"])


# ---------------------------------------------------------------------------
# Plain-JAX glue: bilinear resize as separable matmuls (NCHW, fp32 weights)
# ---------------------------------------------------------------------------
def _resize_matrix(out_size, in_size):
    """Row-stochastic bilinear interpolation matrix, align_corners=False."""
    if out_size == in_size:
        return jnp.eye(in_size, dtype=jnp.float32)
    scale = in_size / out_size
    real = (jnp.arange(out_size, dtype=jnp.float32) + 0.5) * scale - 0.5
    real = jnp.clip(real, 0.0, in_size - 1)
    i0 = jnp.floor(real).astype(jnp.int32)
    i1 = jnp.minimum(i0 + 1, in_size - 1)
    frac = real - i0.astype(jnp.float32)
    rows = jnp.arange(out_size)
    m = jnp.zeros((out_size, in_size), jnp.float32)
    m = m.at[rows, i0].add(1.0 - frac)
    m = m.at[rows, i1].add(frac)
    return m


def resize_bilinear_nchw(x, out_h, out_w):
    """F.interpolate(mode='bilinear', align_corners=False) on NCHW input."""
    n, c, h, w = x.shape
    if out_h == h and out_w == w:
        return x
    rh = _resize_matrix(out_h, h)                       # (out_h, h)
    rw = _resize_matrix(out_w, w)                       # (out_w, w)
    x32 = x.astype(jnp.float32)
    t = jnp.einsum('oh,nchw->ncow', rh, x32)            # resize H
    y = jnp.einsum('ncow,pw->ncop', t, rw)              # resize W
    return y.astype(x.dtype)


# ---------------------------------------------------------------------------
# Forward pass (Pallas)
# ---------------------------------------------------------------------------
def paf_forward(base_nchw, guid_nchw, ft_p, ca_p, after_relu=False):
    n, cin, hb, wb = base_nchw.shape
    _, _, hg, wg = guid_nchw.shape
    cmid = ft_p["w2"].shape[0]

    if after_relu:
        base_nchw = jax.nn.relu(base_nchw)
        guid_nchw = jax.nn.relu(guid_nchw)

    # --- guidance_query = feature_transform(guidance_feat)  (kernel 1) ---
    pg = hg * wg
    tpg, pg_pad = _choose_tile(pg)
    guid_flat = _pad_pixels(guid_nchw.reshape(n, cin, pg), pg_pad)
    gq = feature_transform_pallas(guid_flat, ft_p, tpg)          # (n, cmid, pg_pad)
    gq = gq[:, :, :pg].reshape(n, cmid, hg, wg)

    # --- bilinear resizes (separable matmuls, plain JAX glue) ---
    gq_r = resize_bilinear_nchw(gq, hb, wb)                      # (n, cmid, hb, wb)
    rg = resize_bilinear_nchw(guid_nchw, hb, wb)                 # (n, cin,  hb, wb)

    # --- fused: FT(base), channel_adapter, sigmoid, blend  (kernel 2) ---
    pb = hb * wb
    tpb, pb_pad = _choose_tile(pb)
    base_flat = _pad_pixels(base_nchw.reshape(n, cin, pb), pb_pad)
    gq_flat = _pad_pixels(gq_r.reshape(n, cmid, pb), pb_pad)
    rg_flat = _pad_pixels(rg.reshape(n, cin, pb), pb_pad)
    fused = paf_fuse_pallas(base_flat, gq_flat, rg_flat, ft_p, ca_p, tpb)
    return fused[:, :, :pb].reshape(n, cin, hb, wb)


# ---------------------------------------------------------------------------
# Pure-JAX reference (unfolded params; mirrors the PyTorch forward exactly)
# ---------------------------------------------------------------------------
def _ft_ref_nchw(x, p):
    h = jnp.einsum('mc,nchw->nmhw', p["w1_raw"], x) + p["b1_raw"][None, :, None, None]
    h = h * p["d_raw"][None, :, None, None]
    y = jnp.einsum('om,nmhw->nohw', p["w2_raw"], h)
    return y * p["bn_scale"][None, :, None, None] + p["bn_shift"][None, :, None, None]


def paf_forward_ref(base_nchw, guid_nchw, ft_raw, ca_raw, after_relu=False):
    _, _, hb, wb = base_nchw.shape
    if after_relu:
        base_nchw = jax.nn.relu(base_nchw)
        guid_nchw = jax.nn.relu(guid_nchw)
    gq = _ft_ref_nchw(guid_nchw, ft_raw)
    bk = _ft_ref_nchw(base_nchw, ft_raw)
    gq_r = resize_bilinear_nchw(gq, hb, wb)
    rg = resize_bilinear_nchw(guid_nchw, hb, wb)
    sim = jax.nn.sigmoid(_ft_ref_nchw(bk * gq_r, ca_raw))
    return (1.0 - sim) * base_nchw + sim * rg


# ---------------------------------------------------------------------------
# Parameter construction (BottConv + eval-mode BN) and host-side folding
# ---------------------------------------------------------------------------
def make_branch_params(key, c_in, c_out, eps=1e-5):
    ks = jax.random.split(key, 8)
    w1 = 0.1 * jax.random.normal(ks[0], (BOTT_MID, c_in), jnp.float32)   # pointwise_1
    b1 = 0.1 * jax.random.normal(ks[1], (BOTT_MID,), jnp.float32)        # pointwise_1 bias
    d = 0.5 + 0.1 * jax.random.normal(ks[2], (BOTT_MID,), jnp.float32)   # depthwise 1x1
    w2 = 0.1 * jax.random.normal(ks[3], (c_out, BOTT_MID), jnp.float32)  # pointwise_2
    gamma = 1.0 + 0.1 * jax.random.normal(ks[4], (c_out,), jnp.float32)
    beta = 0.1 * jax.random.normal(ks[5], (c_out,), jnp.float32)
    rmean = 0.1 * jax.random.normal(ks[6], (c_out,), jnp.float32)
    rvar = jnp.abs(1.0 + 0.1 * jax.random.normal(ks[7], (c_out,), jnp.float32))
    bn_scale = gamma / jnp.sqrt(rvar + eps)
    bn_shift = beta - rmean * bn_scale
    return {"w1_raw": w1, "b1_raw": b1, "d_raw": d, "w2_raw": w2,
            "bn_scale": bn_scale, "bn_shift": bn_shift}


def fold_branch_params(p):
    """Fold depthwise 1x1 scale and eval-mode BN scale into the matmul weights."""
    w1f = p["d_raw"][:, None] * p["w1_raw"]            # (mid, cin)
    b1f = (p["d_raw"] * p["b1_raw"])[:, None]          # (mid, 1)
    w2f = p["bn_scale"][:, None] * p["w2_raw"]         # (cout, mid)
    shift = p["bn_shift"][:, None]                     # (cout, 1)
    return {"w1": w1f, "b1": b1f, "w2": w2f, "shift": shift}


if __name__ == "__main__":
    key = jax.random.PRNGKey(0)
    k_base, k_guid, k_ft, k_ca = jax.random.split(key, 4)

    N, C_IN, C_MID = 2, 8, 8
    HB, WB = 16, 16          # base_feat spatial size
    HG, WG = 8, 8            # guidance_feat spatial size (upsampled by PAF)

    base_feat = jax.random.normal(k_base, (N, C_IN, HB, WB), jnp.float32)
    guidance_feat = jax.random.normal(k_guid, (N, C_IN, HG, WG), jnp.float32)

    ft_raw = make_branch_params(k_ft, C_IN, C_MID)   # feature_transform
    ca_raw = make_branch_params(k_ca, C_MID, C_IN)   # channel_adapter
    ft_params = fold_branch_params(ft_raw)
    ca_params = fold_branch_params(ca_raw)

    fwd = jax.jit(functools.partial(paf_forward, after_relu=False))
    out = fwd(base_feat, guidance_feat, ft_params, ca_params)
    out = jax.block_until_ready(out)

    ref = paf_forward_ref(base_feat, guidance_feat, ft_raw, ca_raw)
    assert out.shape == base_feat.shape
    assert jnp.max(jnp.abs(out - ref)) < 1e-3, "Pallas output mismatch vs JAX reference"

    print("KERNEL_OK")
</pallas_src>

<mosaic_0001>
module attributes {stable_mosaic.version = 11 : i64} {
  func.func private @main(%arg0: i32) attributes {dimension_semantics = [#tpu.dimension_semantics<core_parallel>], iteration_bounds = array<i64: 2>, tpu.core_type = #tpu.core_type<sc_scalar_subcore>, window_params = []} {
    return
  }
}

module attributes {stable_mosaic.version = 11 : i64} {
  func.func private @main(%arg0: i32) attributes {dimension_semantics = [#tpu.dimension_semantics<core_parallel>], iteration_bounds = array<i64: 2>, tpu.core_type = #tpu.core_type<sc_scalar_subcore>, window_params = []} {
    return
  }
}

module attributes {stable_mosaic.version = 11 : i64} {
  func.func @ft_kernel(%arg0: i32, %arg1: i32, %arg2: memref<1x8x128xf32, #tpu.memory_space<vmem>>, %arg3: memref<16x8xf32, #tpu.memory_space<vmem>>, %arg4: memref<16x1xf32, #tpu.memory_space<vmem>>, %arg5: memref<8x16xf32, #tpu.memory_space<vmem>>, %arg6: memref<8x1xf32, #tpu.memory_space<vmem>>, %arg7: memref<1x8x128xf32, #tpu.memory_space<vmem>>) attributes {dimension_semantics = [#tpu.dimension_semantics<parallel>, #tpu.dimension_semantics<parallel>], iteration_bounds = array<i64: 2, 1>, scalar_prefetch = 0 : i64, scratch_operands = 0 : i64, tpu.core_type = #tpu.core_type<tc>, window_params = [{transform_indices = @transform_0, window_bounds = array<i64: 1, 8, 128>}, {pipeline_mode = #tpu.pipeline_mode<synchronous>, transform_indices = @transform_1, window_bounds = array<i64: 16, 8>}, {pipeline_mode = #tpu.pipeline_mode<synchronous>, transform_indices = @transform_2, window_bounds = array<i64: 16, 1>}, {pipeline_mode = #tpu.pipeline_mode<synchronous>, transform_indices = @transform_3, window_bounds = array<i64: 8, 16>}, {pipeline_mode = #tpu.pipeline_mode<synchronous>, transform_indices = @transform_4, window_bounds = array<i64: 8, 1>}, {transform_indices = @transform_5, window_bounds = array<i64: 1, 8, 128>}]} {
    %c0 = arith.constant 0 : index
    %c0_0 = arith.constant 0 : index
    %c0_1 = arith.constant 0 : index
    %0 = vector.load %arg2[%c0, %c0_0, %c0_1] : memref<1x8x128xf32, #tpu.memory_space<vmem>>, vector<1x8x128xf32>
    %1 = vector.shape_cast %0 : vector<1x8x128xf32> to vector<8x128xf32>
    %c0_2 = arith.constant 0 : index
    %c0_3 = arith.constant 0 : index
    %2 = vector.load %arg3[%c0_2, %c0_3] : memref<16x8xf32, #tpu.memory_space<vmem>>, vector<16x8xf32>
    %cst = arith.constant dense<0.000000e+00> : vector<16x128xf32>
    %3 = tpu.matmul %2, %1, %cst {dimension_numbers = #tpu.dot_dimension_numbers<[1], [0], [0], [1], [0, 0, 1, 1], [], []>} : vector<16x8xf32>, vector<8x128xf32>, vector<16x128xf32> -> vector<16x128xf32>
    %c0_4 = arith.constant 0 : index
    %c0_5 = arith.constant 0 : index
    %4 = vector.load %arg4[%c0_4, %c0_5] : memref<16x1xf32, #tpu.memory_space<vmem>>, vector<16x1xf32>
    %5 = vector.broadcast %4 : vector<16x1xf32> to vector<16x128xf32>
    %6 = arith.addf %3, %5 : vector<16x128xf32>
    %c0_6 = arith.constant 0 : index
    %c0_7 = arith.constant 0 : index
    %7 = vector.load %arg5[%c0_6, %c0_7] : memref<8x16xf32, #tpu.memory_space<vmem>>, vector<8x16xf32>
    %cst_8 = arith.constant dense<0.000000e+00> : vector<8x128xf32>
    %8 = tpu.matmul %7, %6, %cst_8 {dimension_numbers = #tpu.dot_dimension_numbers<[1], [0], [0], [1], [0, 0, 1, 1], [], []>} : vector<8x16xf32>, vector<16x128xf32>, vector<8x128xf32> -> vector<8x128xf32>
    %c0_9 = arith.constant 0 : index
    %c0_10 = arith.constant 0 : index
    %9 = vector.load %arg6[%c0_9, %c0_10] : memref<8x1xf32, #tpu.memory_space<vmem>>, vector<8x1xf32>
    %10 = vector.broadcast %9 : vector<8x1xf32> to vector<8x128xf32>
    %11 = arith.addf %8, %10 : vector<8x128xf32>
    %c0_11 = arith.constant 0 : index
    %c0_12 = arith.constant 0 : index
    %c0_13 = arith.constant 0 : index
    %12 = vector.load %arg7[%c0_11, %c0_12, %c0_13] : memref<1x8x128xf32, #tpu.memory_space<vmem>>, vector<1x8x128xf32>
    %13 = vector.shape_cast %12 : vector<1x8x128xf32> to vector<8x128xf32>
    %14 = vector.shape_cast %11 : vector<8x128xf32> to vector<1x8x128xf32>
    tpu.vector_store %arg7[%c0_11, %c0_12, %c0_13], %14 {strides = array<i32>} : memref<1x8x128xf32, #tpu.memory_space<vmem>>, vector<1x8x128xf32>,
    return
  }
  func.func @transform_0(%arg0: i32, %arg1: i32) -> (i32, i32, i32) {
    %c0_i32 = arith.constant 0 : i32
    %c0_i32_0 = arith.constant 0 : i32
    return %arg0, %c0_i32, %arg1 : i32, i32, i32
  }
  func.func @transform_1(%arg0: i32, %arg1: i32) -> (i32, i32) {
    %c0_i32 = arith.constant 0 : i32
    %c0_i32_0 = arith.constant 0 : i32
    %c0_i32_1 = arith.constant 0 : i32
    return %c0_i32, %c0_i32_0 : i32, i32
  }
  func.func @transform_2(%arg0: i32, %arg1: i32) -> (i32, i32) {
    %c0_i32 = arith.constant 0 : i32
    %c0_i32_0 = arith.constant 0 : i32
    %c0_i32_1 = arith.constant 0 : i32
    return %c0_i32, %c0_i32_0 : i32, i32
  }
  func.func @transform_3(%arg0: i32, %arg1: i32) -> (i32, i32) {
    %c0_i32 = arith.constant 0 : i32
    %c0_i32_0 = arith.constant 0 : i32
    %c0_i32_1 = arith.constant 0 : i32
    return %c0_i32, %c0_i32_0 : i32, i32
  }
  func.func @transform_4(%arg0: i32, %arg1: i32) -> (i32, i32) {
    %c0_i32 = arith.constant 0 : i32
    %c0_i32_0 = arith.constant 0 : i32
    %c0_i32_1 = arith.constant 0 : i32
    return %c0_i32, %c0_i32_0 : i32, i32
  }
  func.func @transform_5(%arg0: i32, %arg1: i32) -> (i32, i32, i32) {
    %c0_i32 = arith.constant 0 : i32
    %c0_i32_0 = arith.constant 0 : i32
    return %arg0, %c0_i32, %arg1 : i32, i32, i32
  }
}

module attributes {stable_mosaic.version = 11 : i64} {
  func.func @paf_fuse_kernel(%arg0: i32, %arg1: i32, %arg2: memref<1x8x128xf32, #tpu.memory_space<vmem>>, %arg3: memref<1x8x128xf32, #tpu.memory_space<vmem>>, %arg4: memref<1x8x128xf32, #tpu.memory_space<vmem>>, %arg5: memref<16x8xf32, #tpu.memory_space<vmem>>, %arg6: memref<16x1xf32, #tpu.memory_space<vmem>>, %arg7: memref<8x16xf32, #tpu.memory_space<vmem>>, %arg8: memref<8x1xf32, #tpu.memory_space<vmem>>, %arg9: memref<16x8xf32, #tpu.memory_space<vmem>>, %arg10: memref<16x1xf32, #tpu.memory_space<vmem>>, %arg11: memref<8x16xf32, #tpu.memory_space<vmem>>, %arg12: memref<8x1xf32, #tpu.memory_space<vmem>>, %arg13: memref<1x8x128xf32, #tpu.memory_space<vmem>>) attributes {dimension_semantics = [#tpu.dimension_semantics<parallel>, #tpu.dimension_semantics<parallel>], iteration_bounds = array<i64: 2, 2>, scalar_prefetch = 0 : i64, scratch_operands = 0 : i64, tpu.core_type = #tpu.core_type<tc>, window_params = [{transform_indices = @transform_0, window_bounds = array<i64: 1, 8, 128>}, {transform_indices = @transform_1, window_bounds = array<i64: 1, 8, 128>}, {transform_indices = @transform_2, window_bounds = array<i64: 1, 8, 128>}, {pipeline_mode = #tpu.pipeline_mode<synchronous>, transform_indices = @transform_3, window_bounds = array<i64: 16, 8>}, {pipeline_mode = #tpu.pipeline_mode<synchronous>, transform_indices = @transform_4, window_bounds = array<i64: 16, 1>}, {pipeline_mode = #tpu.pipeline_mode<synchronous>, transform_indices = @transform_5, window_bounds = array<i64: 8, 16>}, {pipeline_mode = #tpu.pipeline_mode<synchronous>, transform_indices = @transform_6, window_bounds = array<i64: 8, 1>}, {pipeline_mode = #tpu.pipeline_mode<synchronous>, transform_indices = @transform_7, window_bounds = array<i64: 16, 8>}, {pipeline_mode = #tpu.pipeline_mode<synchronous>, transform_indices = @transform_8, window_bounds = array<i64: 16, 1>}, {pipeline_mode = #tpu.pipeline_mode<synchronous>, transform_indices = @transform_9, window_bounds = array<i64: 8, 16>}, {pipeline_mode = #tpu.pipeline_mode<synchronous>, transform_indices = @transform_10, window_bounds = array<i64: 8, 1>}, {transform_indices = @transform_11, window_bounds = array<i64: 1, 8, 128>}]} {
    %c0 = arith.constant 0 : index
    %c0_0 = arith.constant 0 : index
    %c0_1 = arith.constant 0 : index
    %0 = vector.load %arg2[%c0, %c0_0, %c0_1] : memref<1x8x128xf32, #tpu.memory_space<vmem>>, vector<1x8x128xf32>
    %1 = vector.shape_cast %0 : vector<1x8x128xf32> to vector<8x128xf32>
    %c0_2 = arith.constant 0 : index
    %c0_3 = arith.constant 0 : index
    %2 = vector.load %arg5[%c0_2, %c0_3] : memref<16x8xf32, #tpu.memory_space<vmem>>, vector<16x8xf32>
    %cst = arith.constant dense<0.000000e+00> : vector<16x128xf32>
    %3 = tpu.matmul %2, %1, %cst {dimension_numbers = #tpu.dot_dimension_numbers<[1], [0], [0], [1], [0, 0, 1, 1], [], []>} : vector<16x8xf32>, vector<8x128xf32>, vector<16x128xf32> -> vector<16x128xf32>
    %c0_4 = arith.constant 0 : index
    %c0_5 = arith.constant 0 : index
    %4 = vector.load %arg6[%c0_4, %c0_5] : memref<16x1xf32, #tpu.memory_space<vmem>>, vector<16x1xf32>
    %5 = vector.broadcast %4 : vector<16x1xf32> to vector<16x128xf32>
    %6 = arith.addf %3, %5 : vector<16x128xf32>
    %c0_6 = arith.constant 0 : index
    %c0_7 = arith.constant 0 : index
    %7 = vector.load %arg7[%c0_6, %c0_7] : memref<8x16xf32, #tpu.memory_space<vmem>>, vector<8x16xf32>
    %cst_8 = arith.constant dense<0.000000e+00> : vector<8x128xf32>
    %8 = tpu.matmul %7, %6, %cst_8 {dimension_numbers = #tpu.dot_dimension_numbers<[1], [0], [0], [1], [0, 0, 1, 1], [], []>} : vector<8x16xf32>, vector<16x128xf32>, vector<8x128xf32> -> vector<8x128xf32>
    %c0_9 = arith.constant 0 : index
    %c0_10 = arith.constant 0 : index
    %9 = vector.load %arg8[%c0_9, %c0_10] : memref<8x1xf32, #tpu.memory_space<vmem>>, vector<8x1xf32>
    %10 = vector.broadcast %9 : vector<8x1xf32> to vector<8x128xf32>
    %11 = arith.addf %8, %10 : vector<8x128xf32>
    %c0_11 = arith.constant 0 : index
    %c0_12 = arith.constant 0 : index
    %c0_13 = arith.constant 0 : index
    %12 = vector.load %arg3[%c0_11, %c0_12, %c0_13] : memref<1x8x128xf32, #tpu.memory_space<vmem>>, vector<1x8x128xf32>
    %13 = vector.shape_cast %12 : vector<1x8x128xf32> to vector<8x128xf32>
    %14 = arith.mulf %11, %13 : vector<8x128xf32>
    %c0_14 = arith.constant 0 : index
    %c0_15 = arith.constant 0 : index
    %15 = vector.load %arg9[%c0_14, %c0_15] : memref<16x8xf32, #tpu.memory_space<vmem>>, vector<16x8xf32>
    %cst_16 = arith.constant dense<0.000000e+00> : vector<16x128xf32>
    %16 = tpu.matmul %15, %14, %cst_16 {dimension_numbers = #tpu.dot_dimension_numbers<[1], [0], [0], [1], [0, 0, 1, 1], [], []>} : vector<16x8xf32>, vector<8x128xf32>, vector<16x128xf32> -> vector<16x128xf32>
    %c0_17 = arith.constant 0 : index
    %c0_18 = arith.constant 0 : index
    %17 = vector.load %arg10[%c0_17, %c0_18] : memref<16x1xf32, #tpu.memory_space<vmem>>, vector<16x1xf32>
    %18 = vector.broadcast %17 : vector<16x1xf32> to vector<16x128xf32>
    %19 = arith.addf %16, %18 : vector<16x128xf32>
    %c0_19 = arith.constant 0 : index
    %c0_20 = arith.constant 0 : index
    %20 = vector.load %arg11[%c0_19, %c0_20] : memref<8x16xf32, #tpu.memory_space<vmem>>, vector<8x16xf32>
    %cst_21 = arith.constant dense<0.000000e+00> : vector<8x128xf32>
    %21 = tpu.matmul %20, %19, %cst_21 {dimension_numbers = #tpu.dot_dimension_numbers<[1], [0], [0], [1], [0, 0, 1, 1], [], []>} : vector<8x16xf32>, vector<16x128xf32>, vector<8x128xf32> -> vector<8x128xf32>
    %c0_22 = arith.constant 0 : index
    %c0_23 = arith.constant 0 : index
    %22 = vector.load %arg12[%c0_22, %c0_23] : memref<8x1xf32, #tpu.memory_space<vmem>>, vector<8x1xf32>
    %23 = vector.broadcast %22 : vector<8x1xf32> to vector<8x128xf32>
    %24 = arith.addf %21, %23 : vector<8x128xf32>
    %25 = arith.negf %24 : vector<8x128xf32>
    %26 = math.exp %25 : vector<8x128xf32>
    %cst_24 = arith.constant 1.000000e+00 : f32
    %27 = vector.broadcast %cst_24 : f32 to vector<8x128xf32>
    %28 = arith.addf %27, %26 : vector<8x128xf32>
    %29 = arith.divf %27, %28 : vector<8x128xf32>
    %c0_25 = arith.constant 0 : index
    %c0_26 = arith.constant 0 : index
    %c0_27 = arith.constant 0 : index
    %30 = vector.load %arg4[%c0_25, %c0_26, %c0_27] : memref<1x8x128xf32, #tpu.memory_space<vmem>>, vector<1x8x128xf32>
    %31 = vector.shape_cast %30 : vector<1x8x128xf32> to vector<8x128xf32>
    %cst_28 = arith.constant 1.000000e+00 : f32
    %32 = vector.broadcast %cst_28 : f32 to vector<8x128xf32>
    %33 = arith.subf %32, %29 : vector<8x128xf32>
    %34 = arith.mulf %33, %1 : vector<8x128xf32>
    %35 = arith.mulf %29, %31 : vector<8x128xf32>
    %36 = arith.addf %34, %35 : vector<8x128xf32>
    %c0_29 = arith.constant 0 : index
    %c0_30 = arith.constant 0 : index
    %c0_31 = arith.constant 0 : index
    %37 = vector.load %arg13[%c0_29, %c0_30, %c0_31] : memref<1x8x128xf32, #tpu.memory_space<vmem>>, vector<1x8x128xf32>
    %38 = vector.shape_cast %37 : vector<1x8x128xf32> to vector<8x128xf32>
    %39 = vector.shape_cast %36 : vector<8x128xf32> to vector<1x8x128xf32>
    tpu.vector_store %arg13[%c0_29, %c0_30, %c0_31], %39 {strides = array<i32>} : memref<1x8x128xf32, #tpu.memory_space<vmem>>, vector<1x8x128xf32>,
    return
  }
  func.func @transform_0(%arg0: i32, %arg1: i32) -> (i32, i32, i32) {
    %c0_i32 = arith.constant 0 : i32
    %c0_i32_0 = arith.constant 0 : i32
    return %arg0, %c0_i32, %arg1 : i32, i32, i32
  }
  func.func @transform_1(%arg0: i32, %arg1: i32) -> (i32, i32, i32) {
    %c0_i32 = arith.constant 0 : i32
    %c0_i32_0 = arith.constant 0 : i32
    return %arg0, %c0_i32, %arg1 : i32, i32, i32
  }
  func.func @transform_2(%arg0: i32, %arg1: i32) -> (i32, i32, i32) {
    %c0_i32 = arith.constant 0 : i32
    %c0_i32_0 = arith.constant 0 : i32
    return %arg0, %c0_i32, %arg1 : i32, i32, i32
  }
  func.func @transform_3(%arg0: i32, %arg1: i32) -> (i32, i32) {
    %c0_i32 = arith.constant 0 : i32
    %c0_i32_0 = arith.constant 0 : i32
    %c0_i32_1 = arith.constant 0 : i32
    return %c0_i32, %c0_i32_0 : i32, i32
  }
  func.func @transform_4(%arg0: i32, %arg1: i32) -> (i32, i32) {
    %c0_i32 = arith.constant 0 : i32
    %c0_i32_0 = arith.constant 0 : i32
    %c0_i32_1 = arith.constant 0 : i32
    return %c0_i32, %c0_i32_0 : i32, i32
  }
  func.func @transform_5(%arg0: i32, %arg1: i32) -> (i32, i32) {
    %c0_i32 = arith.constant 0 : i32
    %c0_i32_0 = arith.constant 0 : i32
    %c0_i32_1 = arith.constant 0 : i32
    return %c0_i32, %c0_i32_0 : i32, i32
  }
  func.func @transform_6(%arg0: i32, %arg1: i32) -> (i32, i32) {
    %c0_i32 = arith.constant 0 : i32
    %c0_i32_0 = arith.constant 0 : i32
    %c0_i32_1 = arith.constant 0 : i32
    return %c0_i32, %c0_i32_0 : i32, i32
  }
  func.func @transform_7(%arg0: i32, %arg1: i32) -> (i32, i32) {
    %c0_i32 = arith.constant 0 : i32
    %c0_i32_0 = arith.constant 0 : i32
    %c0_i32_1 = arith.constant 0 : i32
    return %c0_i32, %c0_i32_0 : i32, i32
  }
  func.func @transform_8(%arg0: i32, %arg1: i32) -> (i32, i32) {
    %c0_i32 = arith.constant 0 : i32
    %c0_i32_0 = arith.constant 0 : i32
    %c0_i32_1 = arith.constant 0 : i32
    return %c0_i32, %c0_i32_0 : i32, i32
  }
  func.func @transform_9(%arg0: i32, %arg1: i32) -> (i32, i32) {
    %c0_i32 = arith.constant 0 : i32
    %c0_i32_0 = arith.constant 0 : i32
    %c0_i32_1 = arith.constant 0 : i32
    return %c0_i32, %c0_i32_0 : i32, i32
  }
  func.func @transform_10(%arg0: i32, %arg1: i32) -> (i32, i32) {
    %c0_i32 = arith.constant 0 : i32
    %c0_i32_0 = arith.constant 0 : i32
    %c0_i32_1 = arith.constant 0 : i32
    return %c0_i32, %c0_i32_0 : i32, i32
  }
  func.func @transform_11(%arg0: i32, %arg1: i32) -> (i32, i32, i32) {
    %c0_i32 = arith.constant 0 : i32
    %c0_i32_0 = arith.constant 0 : i32
    return %arg0, %c0_i32, %arg1 : i32, i32, i32
  }
}

</mosaic_0001>

<bundles_post_ra>
// kernel: paf_forward.2
= control target key start
LH: loop header
LB: loop body
LE: loop exit
PB: predicated region body
PF: predicated region fallthrough
CT: control target
= control target key end

     0   :  { %s625_s18 = smov 0   ;;  %s627_s19 = smov 0   ;;  %s681_s0 = inlined_call_operand.vmem [shape: f32[2,8,128], index: 0, kind: input, shape index: {}]   ;;  %s682_s1 = inlined_call_operand.vmem [shape: f32[16,8], index: 1, kind: input, shape index: {}]   ;;  %s683_s2 = inlined_call_operand.vmem [shape: f32[16,1], index: 2, kind: input, shape index: {}]   ;;  %s684_s3 = inlined_call_operand.vmem [shape: f32[8,16], index: 3, kind: input, shape index: {}]   ;;  %s685_s4 = inlined_call_operand.vmem [shape: f32[8,1], index: 4, kind: input, shape index: {}]   ;;  %s686_s5 = inlined_call_operand.vmem [shape: f32[2,8,128], index: 5, kind: output, shape index: {}]  }
   0x1   :  { %s629_s20 = smov 0  }
   0x2 LB: > { %s27_s21 = sadd.s32 1, %s585_s19  ;;  %p508_p0 = scmp.ge.s32.totalorder %s589_s20, 1  ;;  %s589_s20 = sphi %s629_s20, %s15_s20   ;;  %s585_s19 = sphi %s627_s19, %s688_s19   ;;  %s581_s18 = sphi %s625_s18, %s687_s18  }
   0x3   : > { %p29_p1 = scmp.ge.s32.totalorder %s27_s21, 2  ;;  %p205_p2 = scmp.lt.s32.totalorder %s589_s20, 3 }
   0x5   : > { %s690_s21 = smov (%p29_p1, %s27_s21), 0  ;;  %p206_p3 = pnand %p508_p0, %p205_p2 }
   0x6   : > { %p237_p4 = scmp.lt.s32.totalorder (!%p206_p3), %s581_s18, 1  ;;  %v252_v0 = vld [vmem:[%s682_s1] sm:$0xff] (!%p206_p3)  ;;  %vm266_vm0 = vcmask (!%p206_p3), 64512   ;;  %v591_v2 = vmov (!%p206_p3), 0   ;;  %v255_v3 = vld [vmem:[%s683_s2 + $0x8] sm:$0xff] (!%p206_p3)  ;;  %v592_v6 = vmov (!%p206_p3), 0.0|0.0  }
   0x7   : > { %209 = sbr.rel (%p206_p3) target bundleno = 455 (0x1c7), region = 40  ;;  %v254_v1 = vld [vmem:[%s683_s2] sm:$0xff] (!%p206_p3)  ;;  %524 = vmatprep.mubr.msk.f32.mxu0 (!%p206_p3), %vm266_vm0, %v252_v0  ;;  %565 = vset.pattern.permute.xlu0 (!%p206_p3), %v591_v2  ;;  %v253_v5 = vld [vmem:[%s682_s1 + $0x8] sm:$0xff] (!%p206_p3)  ;;  %vm593_vm1 = vmmov (!%p206_p3), 0   ;;  %v594_v7 = vmov (!%p206_p3), 0.0   ;;  %vm355_vm2 = vcmask (!%p206_p3), 130048  }
   0x8   : > { %258 = vperm.xlu0 (!%p206_p3), %565, %v254_v1   ;;  %566 = vset.pattern.permute.xlu1 (!%p206_p3), %v591_v2  ;;  %v349_v8 = vld [vmem:[%s685_s4] sm:$0xff] (!%p206_p3) }
   0x9   : > { %534 = vmatprep.subr.bf16.mxu1 (!%p206_p3), %v592_v6  ;;  %531 = vmatprep.mubr.msk.f32.mxu1 (!%p206_p3), %vm593_vm1, %v594_v7  ;;  %v348_v16 = vld [vmem:[%s684_s3] sm:$0xff] (!%p206_p3) }
   0xa   : > { %352 = vperm.xlu1 (!%p206_p3), %566, %v349_v8  }
   0xc   : > { %263 = vperm.xlu0 (!%p206_p3), %565, %v255_v3  }
   0xe   : > { %s692_s18 = smov (!%p237_p4, %s581_s18), 1 }
   0xf   : > { %s509_s28 = sshll.u32 %s692_s18, 3 }
  0x10   : > { %s243_s6 = scalar_lea.vmem %s681_s0, %s509_s28  ;;  %s250_s15 = scalar_lea.vmem %s686_s5, %s509_s28 }
  0x11   : > { %v251_v4 = vld [vmem:[%s243_s6] sm:$0xff] }
  0x12   : > { %522 = vmatprep.subr.mxu0 %v251_v4 }
  0x13   : > { %523 = vmatpush3.msra.mxu0 %v251_v4 }
  0x14   : > { %525 = vmatmul.mubr.msk.f32.vlgmr.msra.gmra.mrb[0].mxu0 %vm266_vm0, %v253_v5 }
  0x87   : > { %v259_v9 = vpop.permute.xlu0 %258 }
  0x89   : > { %v353_v17 = vpop.permute.xlu1 %352 }
  0x8b   : > { %v264_v10 = vpop.permute.xlu0 %263 }
  0xe7   : > { %v526_v11 = vpop.f32.mrb[0].mxu0 }
  0xe8   : > { %v345_v12 = vadd.f32 %v526_v11, %v264_v10  ;;  %v339_v13 = vpop.f32.mrb[1].mxu0 }
  0xe9   : > { %v340_v14 = vadd.f32 %v339_v13, %v259_v9 }
  0xeb   : > { %v535_v15 = vpack.c.bf16 %v345_v12, %v340_v14 }
  0xed   : > { %536 = vmatpush3.bf16.msra.mxu1 %v535_v15 }
  0xf0   : > { %532 = vmatmul.mubr.msk.f32.vlgmr.msra.gmra.mrb[0].mxu1 %vm355_vm2, %v348_v16 }
 0x1c3   : > { %v425_v18 = vpop.f32.mrb[0].mxu1 }
 0x1c4   : > { %v426_v19 = vadd.f32 %v425_v18, %v353_v17  ;;  %v533_v20 = vpop.f32.mrb[1].mxu1 }
 0x1c6   : > { %429 = vst [vmem:[%s250_s15] sm:$0xff] %v426_v19 }
 0x1c7 PF: > { %s15_s20 = sadd.s32 1, %s589_s20   ;;  %s687_s18 = smov %s585_s19 }
 0x1c8   : > { %p12_p5 = scmp.ge.s32.totalorder %s15_s20, 4   ;;  %s688_s19 = smov %s690_s21 }
 0x1ca   :  { %14 = sbr.rel (!%p12_p5) target bundleno = 2 (0x2), region = 70 }

// kernel: paf_forward.3
= control target key start
LH: loop header
LB: loop body
LE: loop exit
PB: predicated region body
PF: predicated region fallthrough
CT: control target
= control target key end

     0   :  { %s1187_s17 = smov 0   ;;  %s1189_s18 = smov 0   ;;  %s1299_s0 = inlined_call_operand.vmem [shape: f32[2,8,256], index: 0, kind: input, shape index: {}]   ;;  %s1300_s1 = inlined_call_operand.vmem [shape: f32[2,8,256], index: 1, kind: input, shape index: {}]   ;;  %s1301_s2 = inlined_call_operand.vmem [shape: f32[2,8,256], index: 2, kind: input, shape index: {}]   ;;  %s1302_s3 = inlined_call_operand.vmem [shape: f32[16,8], index: 3, kind: input, shape index: {}]   ;;  %s1303_s4 = inlined_call_operand.vmem [shape: f32[16,1], index: 4, kind: input, shape index: {}]   ;;  %s1304_s5 = inlined_call_operand.vmem [shape: f32[8,16], index: 5, kind: input, shape index: {}]   ;;  %s1305_s6 = inlined_call_operand.vmem [shape: f32[8,1], index: 6, kind: input, shape index: {}]   ;;  %s1306_s7 = inlined_call_operand.vmem [shape: f32[16,8], index: 7, kind: input, shape index: {}]   ;;  %s1307_s8 = inlined_call_operand.vmem [shape: f32[16,1], index: 8, kind: input, shape index: {}]   ;;  %s1308_s9 = inlined_call_operand.vmem [shape: f32[8,16], index: 9, kind: input, shape index: {}]   ;;  %s1309_s10 = inlined_call_operand.vmem [shape: f32[8,1], index: 10, kind: input, shape index: {}]   ;;  %s1310_s11 = inlined_call_operand.vmem [shape: f32[2,8,256], index: 11, kind: output, shape index: {}]  }
   0x1   :  { %s1191_s19 = smov 0   ;;  %s1193_s20 = smov 0  }
   0x2   :  { %s1195_s21 = smov 0  }
   0x3 LB: > { %s30_s22 = sadd.s32 1, %s1113_s19  ;;  %s33_s23 = sadd.s32 1, %s1117_s20  ;;  %s1121_s21 = sphi %s1195_s21, %s21_s21   ;;  %s1117_s20 = sphi %s1193_s20, %s1314_s20   ;;  %s1113_s19 = sphi %s1191_s19, %s1313_s19   ;;  %s1109_s18 = sphi %s1189_s18, %s1312_s18   ;;  %s1105_s17 = sphi %s1187_s17, %s1311_s17  }
   0x4   : > { %p31_p0 = scmp.ge.s32.totalorder %s30_s22, 2  ;;  %p973_p1 = scmp.ge.s32.totalorder %s1121_s21, 1 }
   0x5   : > { %p386_p2 = scmp.lt.s32.totalorder %s1121_s21, 5 }
   0x6   : > { %s1316_s22 = smov (%p31_p0, %s30_s22), 0  ;;  %s1318_s23 = smov (!%p31_p0, %s33_s23), %s1117_s20 }
   0x7   : > { %p387_p3 = pnand %p973_p1, %p386_p2  ;;  %p35_p4 = scmp.ge.s32.totalorder %s1318_s23, 2 }
   0x8   : > { %p448_p5 = scmp.lt.s32.totalorder (!%p387_p3), %s1109_s18, 1  ;;  %p450_p6 = scmp.lt.s32.totalorder (!%p387_p3), %s1105_s17, 1  ;;  %v481_v0 = vld [vmem:[%s1302_s3] sm:$0xff] (!%p387_p3)  ;;  %vm495_vm0 = vcmask (!%p387_p3), 64512   ;;  %v1123_v1 = vmov (!%p387_p3), 0   ;;  %v484_v3 = vld [vmem:[%s1303_s4 + $0x8] sm:$0xff] (!%p387_p3) }
   0x9   : > { %s1320_s23 = smov (%p35_p4, %s1318_s23), 0  ;;  %390 = sbr.rel (%p387_p3) target bundleno = 929 (0x3a1), region = 64 }
   0xa   : > { %1005 = vmatprep.mubr.msk.f32.mxu0 (!%p387_p3), %vm495_vm0, %v481_v0  ;;  %1077 = vset.pattern.permute.xlu0 (!%p387_p3), %v1123_v1  ;;  %v483_v2 = vld [vmem:[%s1303_s4] sm:$0xff] (!%p387_p3)  ;;  %v663_v4 = vld [vmem:[%s1307_s8 + $0x8] sm:$0xff] (!%p387_p3)  ;;  %v1124_v7 = vmov (!%p387_p3), 0.0|0.0   ;;  %vm1125_vm1 = vmmov (!%p387_p3), 0   ;;  %v1126_v8 = vmov (!%p387_p3), 0.0   ;;  %vm584_vm2 = vcmask (!%p387_p3), 130048  }
   0xb   : > { %487 = vperm.xlu0 (!%p387_p3), %1077, %v483_v2   ;;  %1078 = vset.pattern.permute.xlu1 (!%p387_p3), %v1123_v1  ;;  %v482_v6 = vld [vmem:[%s1302_s3 + $0x8] sm:$0xff] (!%p387_p3)  ;;  %v578_v9 = vld [vmem:[%s1305_s6] sm:$0xff] (!%p387_p3) }
   0xc   : > { %1027 = vmatprep.subr.bf16.mxu1 (!%p387_p3), %v1124_v7  ;;  %1012 = vmatprep.mubr.msk.f32.mxu1 (!%p387_p3), %vm1125_vm1, %v1126_v8  ;;  %v662_v10 = vld [vmem:[%s1307_s8] sm:$0xff] (!%p387_p3)  ;;  %v661_v27 = vld [vmem:[%s1306_s7 + $0x8] sm:$0xff] (!%p387_p3) }
   0xd   : > { %581 = vperm.xlu1 (!%p387_p3), %1078, %v578_v9   ;;  %v756_v11 = vld [vmem:[%s1309_s10] sm:$0xff] (!%p387_p3) }
   0xe   : > { %v577_v19 = vld [vmem:[%s1304_s5] sm:$0xff] (!%p387_p3) }
   0xf   : > { %492 = vperm.xlu0 (!%p387_p3), %1077, %v484_v3   ;;  %v660_v20 = vld [vmem:[%s1306_s7] sm:$0xff] (!%p387_p3) }
  0x10   : > { %s1322_s18 = smov (!%p448_p5, %s1109_s18), 1  ;;  %s1324_s17 = smov (!%p450_p6, %s1105_s17), 1  ;;  %v755_v35 = vld [vmem:[%s1308_s9] sm:$0xff] }
  0x11   : > { %s974_s30 = sshll.u32 %s1322_s18, 1  ;;  %666 = vperm.xlu1 %1078, %v662_v10  }
  0x12   : > { %s453_s12 = sadd.s32 %s974_s30, %s1324_s17 }
  0x13   : > { %s1227_s13 = sshll.u32 %s453_s12, 3  ;;  %671 = vperm.xlu0 %1077, %v663_v4  }
  0x14   : > { %s455_s16 = scalar_lea.vmem %s1299_s0, %s1227_s13  ;;  %s463_s27 = scalar_lea.vmem %s1300_s1, %s1227_s13 }
  0x15   : > { %v1236_v5 = vld [vmem:[%s455_s16] sm:$0xff]  ;;  %759 = vperm.xlu1 %1078, %v756_v11   ;;  %s471_s14 = scalar_lea.vmem %s1301_s2, %s1227_s13  ;;  %s479_s24 = scalar_lea.vmem %s1310_s11, %s1227_s13 }
  0x16   : > { %1003 = vmatprep.subr.mxu0 %v1236_v5  ;;  %v658_v23 = vld [vmem:[%s463_s27] sm:$0xff] }
  0x17   : > { %1004 = vmatpush3.msra.mxu0 %v1236_v5  ;;  %v841_v44 = vld [vmem:[%s471_s14] sm:$0xff] }
  0x18   : > { %1006 = vmatmul.mubr.msk.f32.vlgmr.msra.gmra.mrb[0].mxu0 %vm495_vm0, %v482_v6 }
  0x19   : > { %1017 = vmatprep.mubr.msk.f32.mxu0 %vm495_vm0, %v660_v20 }
  0x8a   : > { %v488_v12 = vpop.permute.xlu0 %487 }
  0x8c   : > { %v582_v21 = vpop.permute.xlu1 %581 }
  0x8e   : > { %v493_v13 = vpop.permute.xlu0 %492 }
  0x90   : > { %v667_v30 = vpop.permute.xlu1 %666 }
  0x92   : > { %v672_v28 = vpop.permute.xlu0 %671 }
  0x94   : > { %v760_v36 = vpop.permute.xlu1 %759 }
  0xeb   : > { %v1007_v14 = vpop.f32.mrb[0].mxu0 }
  0xec   : > { %v574_v15 = vadd.f32 %v1007_v14, %v493_v13  ;;  %v568_v16 = vpop.f32.mrb[1].mxu0 }
  0xed   : > { %v569_v17 = vadd.f32 %v568_v16, %v488_v12 }
  0xef   : > { %v1028_v18 = vpack.c.bf16 %v574_v15, %v569_v17 }
  0xf1   : > { %1029 = vmatpush3.bf16.msra.mxu1 %v1028_v18 }
  0xf2   : > { %1030 = vmatprep.subr.bf16.mxu1 %v1124_v7 }
  0xf4   : > { %1013 = vmatmul.mubr.msk.f32.vlgmr.msra.gmra.mrb[0].mxu1 %vm584_vm2, %v577_v19 }
  0xf5   : > { %1024 = vmatprep.mubr.msk.f32.mxu1 %vm1125_vm1, %v1126_v8 }
 0x1c7   : > { %v654_v22 = vpop.f32.mrb[0].mxu1 }
 0x1c8   : > { %v655_v24 = vadd.f32 %v654_v22, %v582_v21  ;;  %v1014_v25 = vpop.f32.mrb[1].mxu1 }
 0x1ca   : > { %v659_v26 = vmul.f32 %v658_v23, %v655_v24 }
 0x1cc   : > { %1015 = vmatprep.subr.mxu0 %v659_v26 }
 0x1cd   : > { %1016 = vmatpush3.msra.mxu0 %v659_v26 }
 0x1ce   : > { %1018 = vmatmul.mubr.msk.f32.vlgmr.msra.gmra.mrb[2].mxu0 %vm495_vm0, %v661_v27 }
 0x2a1   : > { %v1019_v29 = vpop.f32.mrb[2].mxu0 }
 0x2a2   : > { %v752_v31 = vadd.f32 %v1019_v29, %v672_v28  ;;  %v746_v32 = vpop.f32.mrb[3].mxu0 }
 0x2a3   : > { %v747_v33 = vadd.f32 %v746_v32, %v667_v30 }
 0x2a5   : > { %v1031_v34 = vpack.c.bf16 %v752_v31, %v747_v33 }
 0x2a7   : > { %1032 = vmatpush3.bf16.msra.mxu1 %v1031_v34 }
 0x2aa   : > { %1025 = vmatmul.mubr.msk.f32.vlgmr.msra.gmra.mrb[2].mxu1 %vm584_vm2, %v755_v35 }
 0x37d   : > { %v831_v37 = vpop.f32.mrb[2].mxu1 }
 0x37e   : > { %v832_v38 = vadd.f32 %v831_v37, %v760_v36  ;;  %v1026_v39 = vpop.f32.mrb[3].mxu1 }
 0x380   : > { %v988_v40 = vmul.f32 -1.442695, %v832_v38 }
 0x382   : > { %1079 = vpow2.f32 %v988_v40 }
 0x38c   : > { %v1080_v41 = vpop.eup %1079 }
 0x38d   : > { %v838_v42 = vadd.f32 1.0, %v1080_v41 }
 0x38f   : > { %1081 = vrcp.f32 %v838_v42 }
 0x399   : > { %v1082_v43 = vpop.eup %1081 }
 0x39a   : > { %v842_v45 = vsub.f32 1.0, %v1082_v43  ;;  %v844_v47 = vmul.f32 %v1082_v43, %v841_v44 }
 0x39c   : > { %v843_v46 = vmul.f32 %v842_v45, %v1236_v5 }
 0x39e   : > { %v845_v48 = vadd.f32 %v844_v47, %v843_v46 }
 0x3a0   : > { %846 = vst [vmem:[%s479_s24] sm:$0xff] %v845_v48 }
 0x3a1 PF: > { %s21_s21 = sadd.s32 1, %s1121_s21   ;;  %s1311_s17 = smov %s1113_s19 }
 0x3a2   : > { %p18_p7 = scmp.ge.s32.totalorder %s21_s21, 6   ;;  %s1312_s18 = smov %s1117_s20 }
 0x3a3   : > { %s1313_s19 = smov %s1316_s22  ;;  %s1314_s20 = smov %s1320_s23 }
 0x3a4   :  { %20 = sbr.rel (!%p18_p7) target bundleno = 3 (0x3), region = 100 }

</bundles_post_ra>
